<compile_context>
chip_gen: v7x
topology: tpu7x:2x2x1
jax: 0.10.0
libtpu: 0.0.40
codegen_flags: <defaults>
</compile_context>

<pallas_src>
import math
from functools import partial

import numpy as np
import jax
import jax.numpy as jnp
from jax import lax
from jax.experimental import pallas as pl
from jax.experimental.pallas import tpu as pltpu

# ---- small config (scaled-down but structurally identical to CWSCNNModelWithEEConfig) ----
VOCAB = 64      # (21128 in the real model -- scaled down, synthetic weights)
EMB = 32        # embedding_dim
HID = 32        # hidden_size (== conv out channels; model requires EMB == HID for stacking)
PROJ = 64       # proj_hidden_dim
NLABEL = 5      # label_num
KSIZE = 3       # conv1d_kernel
NLAYERS = 3     # conv1d_cls_layer_num (6 in the real config)
PAD = (KSIZE - 1) // 2

OUT_PAD = 128          # pad logits to 128 lanes -> unmasked full-lane stores
ROWS_PER_BLOCK = 4096  # target rows (=TB*S) per grid step (amortizes per-step overhead)
SUBLANES = 16          # bf16 sublane packing: multi-step block rows must be a multiple of 16
MIN_GRID_STEPS = 2     # prefer >= 2 grid steps so v7x's two TensorCores both get work


def cws_kernel(x_ref, cw_ref, cb_ref, wf_ref, bf_ref, out_ref, *, seq_len):
    # x_ref  : (R, EMB) bf16, R = TB*seq_len flattened rows (whole sequences per block)
    # cw_ref : (NLAYERS*KSIZE, EMB, HID) bf16   -- one (EMB, HID) slab per layer/tap
    # cb_ref : (NLAYERS, 1, HID) f32
    # wf_ref : (HID, OUT_PAD) bf16              -- fused proj@cls, zero-padded lanes
    # bf_ref : (1, OUT_PAD) f32
    # out_ref: (R, OUT_PAD) bf16
    x = x_ref[...].astype(jnp.float32)          # rolls / masks / ReLU in f32 (safe on v5e too)
    R = x.shape[0]

    # Seam masks depend only on the row position within its sequence -> hoisted out of
    # the layer loop.  They zero the conv taps that would bleed across sequence
    # boundaries ('same' zero padding, after flattening whole sequences into rows).
    pos = lax.broadcasted_iota(jnp.int32, (R, 1), 0) % seq_len
    valid_left = pos != 0                        # x[r-1] stays inside the sequence
    valid_right = pos != seq_len - 1             # x[r+1] stays inside the sequence

    for l in range(NLAYERS):
        # Shift neighbours into place with sublane rolls (XLU) and zero the seams.
        xl = jnp.where(valid_left, pltpu.roll(x, shift=1, axis=0), 0.0)        # x[r-1]
        xr = jnp.where(valid_right, pltpu.roll(x, shift=R - 1, axis=0), 0.0)   # x[r+1]
        # 3 accumulating K=EMB dots instead of concat + one K=3*EMB dot: avoids the
        # lane-concat copies and the (R, 3*EMB) intermediate; MXU has huge slack at N=K=32.
        acc = jnp.dot(xl.astype(jnp.bfloat16), cw_ref[l * KSIZE + 0],
                      preferred_element_type=jnp.float32)
        acc = acc + jnp.dot(x.astype(jnp.bfloat16), cw_ref[l * KSIZE + 1],
                            preferred_element_type=jnp.float32)
        acc = acc + jnp.dot(xr.astype(jnp.bfloat16), cw_ref[l * KSIZE + 2],
                            preferred_element_type=jnp.float32)
        x = jnp.maximum(acc + cb_ref[l], 0.0)    # ReLU; dropout = identity in eval

    # Fused projection + classifier, lane-padded to 128 outputs; bf16 lane-dense store
    # (halves the dominant output writeback stream).
    logits = jnp.dot(x.astype(jnp.bfloat16), wf_ref[...],
                     preferred_element_type=jnp.float32) + bf_ref[...]
    out_ref[...] = logits.astype(out_ref.dtype)


def _choose_tiling(batch, seq_len):
    """Pick TB (whole sequences per grid step) and the padded batch size."""
    # Multi-step blocks must keep R = TB*seq_len a multiple of 16 (bf16 sublane packing);
    # a single-step block equals the full array and has no such constraint.
    tb_gran = SUBLANES // math.gcd(seq_len, SUBLANES)
    tb_budget = max(1, ROWS_PER_BLOCK // seq_len)        # big blocks: amortize step overhead
    tb_split = max(1, -(-batch // MIN_GRID_STEPS))       # >= 2 steps for v7x's 2 TCs
    tb = min(tb_budget, tb_split)
    tb = (tb // tb_gran) * tb_gran
    if tb == 0:
        tb = tb_gran
    if tb >= batch:                                      # single step: block == full array
        return batch, batch
    b_pad = -(-batch // tb) * tb
    return tb, b_pad


def cws_forward(input_ids, params):
    # Embedding lookup is glue (plain-JAX gather); the conv / linear hot path is in-kernel.
    # TODO(synk): fuse the gather via PrefetchScalarGridSpec (input_ids in SMEM) to skip the
    #             extra HBM round trip of the gathered activations (mostly a v5e win).
    x = jnp.take(params["embedding"], input_ids, axis=0)    # (B, S, EMB) f32
    B, S, _ = x.shape

    TB, B_pad = _choose_tiling(B, S)
    if B_pad != B:
        x = jnp.pad(x, ((0, B_pad - B), (0, 0), (0, 0)))
    x_flat = x.reshape(B_pad * S, EMB).astype(jnp.bfloat16)
    R = TB * S
    grid = (B_pad // TB,)

    # Per-layer / per-tap weight slabs (L*K, EMB, HID), bf16 operands for the MXU.
    cw = params["conv_w"].reshape(NLAYERS * KSIZE, EMB, HID).astype(jnp.bfloat16)
    cb = params["conv_b"]                                               # (L, 1, HID) f32

    # Algebraic fusion of projection + classifier (no nonlinearity between them at eval),
    # zero-padded to 128 output lanes for unmasked stores.
    wf = params["proj_w"] @ params["cls_w"]                             # (HID, NLABEL)
    bf = params["proj_b"] @ params["cls_w"] + params["cls_b"]           # (1, NLABEL)
    wf = jnp.zeros((HID, OUT_PAD), jnp.float32).at[:, :NLABEL].set(wf).astype(jnp.bfloat16)
    bf = jnp.zeros((1, OUT_PAD), jnp.float32).at[:, :NLABEL].set(bf)

    def full(a):
        nd = a.ndim
        # Constant index map: the block is fetched once and revisited across grid steps.
        # TODO(synk): at real scale (NLAYERS=6, EMB=HID=300) stream per-layer weight slabs
        #             (grid axis over L or manual DMA), single-buffer them, and set
        #             vmem_limit_bytes explicitly so the tiling fits v7x's 64 MiB VMEM.
        return pl.BlockSpec(a.shape, lambda i, _nd=nd: (0,) * _nd)

    out = pl.pallas_call(
        partial(cws_kernel, seq_len=S),
        out_shape=jax.ShapeDtypeStruct((B_pad * S, OUT_PAD), jnp.bfloat16),
        grid=grid,
        in_specs=[
            pl.BlockSpec((R, EMB), lambda i: (i, 0)),     # TB whole sequences per step
            full(cw), full(cb), full(wf), full(bf),       # weights fully VMEM-resident
        ],
        out_specs=pl.BlockSpec((R, OUT_PAD), lambda i: (i, 0)),
        compiler_params=pltpu.CompilerParams(dimension_semantics=("parallel",)),
    )(x_flat, cw, cb, wf, bf)

    # TODO(synk): pack 4 tokens per 128-lane output row (or compute argmax in-kernel) to cut
    #             the padded writeback + this slice pass a further 4x if measurement pays off.
    logits = out.reshape(B_pad, S, OUT_PAD)[:B, :, :NLABEL]
    return logits.astype(jnp.float32)


def init_params(key):
    ks = jax.random.split(key, 7)
    scale = 0.1
    return {
        "embedding": jax.random.normal(ks[0], (VOCAB, EMB), jnp.float32),
        # conv weights stored as (L, K, C_in, C_out): conv_w[l, k] == torch_weight[l][:, :, k].T
        "conv_w": jax.random.normal(ks[1], (NLAYERS, KSIZE, EMB, HID), jnp.float32) * scale,
        "conv_b": jax.random.normal(ks[2], (NLAYERS, 1, HID), jnp.float32) * scale,
        "proj_w": jax.random.normal(ks[3], (HID, PROJ), jnp.float32) * scale,
        "proj_b": jax.random.normal(ks[4], (1, PROJ), jnp.float32) * scale,
        "cls_w": jax.random.normal(ks[5], (PROJ, NLABEL), jnp.float32) * scale,
        "cls_b": jax.random.normal(ks[6], (1, NLABEL), jnp.float32) * scale,
    }


def reference(input_ids, params):
    # Pure-JAX f32 reference of the PyTorch forward (eval mode).
    x = jnp.take(params["embedding"], input_ids, axis=0)    # (B, S, EMB)
    B, S, _ = x.shape
    for l in range(NLAYERS):
        xp = jnp.pad(x, ((0, 0), (PAD, PAD), (0, 0)))
        acc = jnp.zeros((B, S, HID), jnp.float32) + params["conv_b"][l]
        for k in range(KSIZE):
            acc = acc + jnp.einsum("bsc,cd->bsd", xp[:, k:k + S, :], params["conv_w"][l, k])
        x = jnp.maximum(acc, 0.0)
    hidden = x @ params["proj_w"] + params["proj_b"]
    return hidden @ params["cls_w"] + params["cls_b"]


if __name__ == "__main__":
    key = jax.random.PRNGKey(0)
    k_par, k_ids1, k_ids2 = jax.random.split(key, 3)
    params = init_params(k_par)

    # Kernel uses bf16 MXU operands / bf16 output (f32 accumulation) + host-fused proj@cls,
    # so the tolerance is relaxed vs. the pure-f32 reference (inference-quality logits).

    # Case 1: B=2, S=16 -> TB=1, grid=2 (multi-block path; both v7x TensorCores get a step).
    ids1 = jax.random.randint(k_ids1, (2, 16), 0, VOCAB, dtype=jnp.int32)
    out1 = jax.block_until_ready(cws_forward(ids1, params))
    np.testing.assert_allclose(np.asarray(out1), np.asarray(reference(ids1, params)),
                               rtol=5e-2, atol=5e-2)

    # Case 2: B=3, S=8 -> TB=2, B_pad=4, grid=2 (padded batch rows + cross-block seam masks).
    ids2 = jax.random.randint(k_ids2, (3, 8), 0, VOCAB, dtype=jnp.int32)
    out2 = jax.block_until_ready(cws_forward(ids2, params))
    np.testing.assert_allclose(np.asarray(out2), np.asarray(reference(ids2, params)),
                               rtol=5e-2, atol=5e-2)

    print("KERNEL_OK")
</pallas_src>

<mosaic_0001>
module attributes {stable_mosaic.version = 11 : i64} {
  func.func @cws_kernel(%arg0: i32, %arg1: memref<16x32xbf16, #tpu.memory_space<vmem>>, %arg2: memref<9x32x32xbf16, #tpu.memory_space<vmem>>, %arg3: memref<3x1x32xf32, #tpu.memory_space<vmem>>, %arg4: memref<32x128xbf16, #tpu.memory_space<vmem>>, %arg5: memref<1x128xf32, #tpu.memory_space<vmem>>, %arg6: memref<16x128xbf16, #tpu.memory_space<vmem>>) attributes {dimension_semantics = [#tpu.dimension_semantics<parallel>], iteration_bounds = array<i64: 2>, scalar_prefetch = 0 : i64, scratch_operands = 0 : i64, tpu.core_type = #tpu.core_type<tc>, window_params = [{transform_indices = @transform_0, window_bounds = array<i64: 16, 32>}, {pipeline_mode = #tpu.pipeline_mode<synchronous>, transform_indices = @transform_1, window_bounds = array<i64: 9, 32, 32>}, {pipeline_mode = #tpu.pipeline_mode<synchronous>, transform_indices = @transform_2, window_bounds = array<i64: 3, 1, 32>}, {pipeline_mode = #tpu.pipeline_mode<synchronous>, transform_indices = @transform_3, window_bounds = array<i64: 32, 128>}, {pipeline_mode = #tpu.pipeline_mode<synchronous>, transform_indices = @transform_4, window_bounds = array<i64: 1, 128>}, {transform_indices = @transform_5, window_bounds = array<i64: 16, 128>}]} {
    %c0 = arith.constant 0 : index
    %c0_0 = arith.constant 0 : index
    %0 = vector.load %arg1[%c0, %c0_0] : memref<16x32xbf16, #tpu.memory_space<vmem>>, vector<16x32xbf16>
    %1 = arith.extf %0 : vector<16x32xbf16> to vector<16x32xf32>
    %2 = tpu.iota {dimensions = array<i32: 0>} : vector<16x1xi32>
    %c16_i32 = arith.constant 16 : i32
    %c0_i32 = arith.constant 0 : i32
    %3 = arith.cmpi eq, %c16_i32, %c0_i32 : i32
    %c1_i32 = arith.constant 1 : i32
    %4 = arith.select %3, %c1_i32, %c16_i32 : i32
    %5 = vector.broadcast %4 : i32 to vector<16x1xi32>
    %6 = arith.remsi %2, %5 : vector<16x1xi32>
    %c0_i32_1 = arith.constant 0 : i32
    %7 = vector.broadcast %c0_i32_1 : i32 to vector<16x1xi32>
    %8 = arith.cmpi ne, %6, %7 : vector<16x1xi32>
    %c0_i32_2 = arith.constant 0 : i32
    %9 = vector.broadcast %c0_i32_2 : i32 to vector<16x1xi32>
    %10 = arith.cmpi slt, %6, %9 : vector<16x1xi32>
    %c0_i32_3 = arith.constant 0 : i32
    %11 = arith.cmpi slt, %4, %c0_i32_3 : i32
    %12 = vector.broadcast %11 : i1 to vector<16x1xi1>
    %13 = vector.broadcast %12 : vector<16x1xi1> to vector<16x1xi1>
    %14 = arith.xori %10, %13 : vector<16x1xi1>
    %15 = arith.andi %14, %8 : vector<16x1xi1>
    %16 = vector.broadcast %4 : i32 to vector<16x1xi32>
    %17 = arith.addi %6, %16 : vector<16x1xi32>
    %18 = arith.select %15, %17, %6 : vector<16x1xi1>, vector<16x1xi32>
    %c0_i32_4 = arith.constant 0 : i32
    %19 = vector.broadcast %c0_i32_4 : i32 to vector<16x1xi32>
    %20 = arith.cmpi ne, %18, %19 : vector<16x1xi32>
    %c15_i32 = arith.constant 15 : i32
    %21 = vector.broadcast %c15_i32 : i32 to vector<16x1xi32>
    %22 = arith.cmpi ne, %18, %21 : vector<16x1xi32>
    %c1_i32_5 = arith.constant 1 : i32
    %23 = tpu.dynamic_rotate %1 by %c1_i32_5 dim 0 : vector<16x32xf32>, i32 -> vector<16x32xf32>
    %cst = arith.constant 0.000000e+00 : f32
    %24 = vector.shape_cast %20 : vector<16x1xi1> to vector<16x1xi1>
    %25 = vector.broadcast %24 : vector<16x1xi1> to vector<16x32xi1>
    %26 = vector.broadcast %cst : f32 to vector<16x32xf32>
    %27 = arith.select %25, %23, %26 : vector<16x32xi1>, vector<16x32xf32>
    %c15_i32_6 = arith.constant 15 : i32
    %28 = tpu.dynamic_rotate %1 by %c15_i32_6 dim 0 : vector<16x32xf32>, i32 -> vector<16x32xf32>
    %cst_7 = arith.constant 0.000000e+00 : f32
    %29 = vector.shape_cast %22 : vector<16x1xi1> to vector<16x1xi1>
    %30 = vector.broadcast %29 : vector<16x1xi1> to vector<16x32xi1>
    %31 = vector.broadcast %cst_7 : f32 to vector<16x32xf32>
    %32 = arith.select %30, %28, %31 : vector<16x32xi1>, vector<16x32xf32>
    %33 = arith.truncf %27 : vector<16x32xf32> to vector<16x32xbf16>
    %c0_8 = arith.constant 0 : index
    %c0_9 = arith.constant 0 : index
    %c0_10 = arith.constant 0 : index
    %34 = vector.load %arg2[%c0_8, %c0_9, %c0_10] : memref<9x32x32xbf16, #tpu.memory_space<vmem>>, vector<1x32x32xbf16>
    %35 = vector.shape_cast %34 : vector<1x32x32xbf16> to vector<32x32xbf16>
    %cst_11 = arith.constant dense<0.000000e+00> : vector<16x32xf32>
    %36 = tpu.matmul %33, %35, %cst_11 {dimension_numbers = #tpu.dot_dimension_numbers<[1], [0], [0], [1], [0, 0, 1, 1], [], []>} : vector<16x32xbf16>, vector<32x32xbf16>, vector<16x32xf32> -> vector<16x32xf32>
    %37 = arith.truncf %1 : vector<16x32xf32> to vector<16x32xbf16>
    %c1 = arith.constant 1 : index
    %c0_12 = arith.constant 0 : index
    %c0_13 = arith.constant 0 : index
    %38 = vector.load %arg2[%c1, %c0_12, %c0_13] : memref<9x32x32xbf16, #tpu.memory_space<vmem>>, vector<1x32x32xbf16>
    %39 = vector.shape_cast %38 : vector<1x32x32xbf16> to vector<32x32xbf16>
    %cst_14 = arith.constant dense<0.000000e+00> : vector<16x32xf32>
    %40 = tpu.matmul %37, %39, %cst_14 {dimension_numbers = #tpu.dot_dimension_numbers<[1], [0], [0], [1], [0, 0, 1, 1], [], []>} : vector<16x32xbf16>, vector<32x32xbf16>, vector<16x32xf32> -> vector<16x32xf32>
    %41 = arith.addf %36, %40 : vector<16x32xf32>
    %42 = arith.truncf %32 : vector<16x32xf32> to vector<16x32xbf16>
    %c2 = arith.constant 2 : index
    %c0_15 = arith.constant 0 : index
    %c0_16 = arith.constant 0 : index
    %43 = vector.load %arg2[%c2, %c0_15, %c0_16] : memref<9x32x32xbf16, #tpu.memory_space<vmem>>, vector<1x32x32xbf16>
    %44 = vector.shape_cast %43 : vector<1x32x32xbf16> to vector<32x32xbf16>
    %cst_17 = arith.constant dense<0.000000e+00> : vector<16x32xf32>
    %45 = tpu.matmul %42, %44, %cst_17 {dimension_numbers = #tpu.dot_dimension_numbers<[1], [0], [0], [1], [0, 0, 1, 1], [], []>} : vector<16x32xbf16>, vector<32x32xbf16>, vector<16x32xf32> -> vector<16x32xf32>
    %46 = arith.addf %41, %45 : vector<16x32xf32>
    %c0_18 = arith.constant 0 : index
    %c0_19 = arith.constant 0 : index
    %c0_20 = arith.constant 0 : index
    %47 = vector.load %arg3[%c0_18, %c0_19, %c0_20] : memref<3x1x32xf32, #tpu.memory_space<vmem>>, vector<1x1x32xf32>
    %48 = vector.shape_cast %47 : vector<1x1x32xf32> to vector<1x32xf32>
    %49 = vector.broadcast %48 : vector<1x32xf32> to vector<16x32xf32>
    %50 = arith.addf %46, %49 : vector<16x32xf32>
    %cst_21 = arith.constant 0.000000e+00 : f32
    %51 = vector.broadcast %cst_21 : f32 to vector<16x32xf32>
    %52 = arith.maximumf %50, %51 : vector<16x32xf32>
    %c1_i32_22 = arith.constant 1 : i32
    %53 = tpu.dynamic_rotate %52 by %c1_i32_22 dim 0 : vector<16x32xf32>, i32 -> vector<16x32xf32>
    %cst_23 = arith.constant 0.000000e+00 : f32
    %54 = vector.shape_cast %20 : vector<16x1xi1> to vector<16x1xi1>
    %55 = vector.broadcast %54 : vector<16x1xi1> to vector<16x32xi1>
    %56 = vector.broadcast %cst_23 : f32 to vector<16x32xf32>
    %57 = arith.select %55, %53, %56 : vector<16x32xi1>, vector<16x32xf32>
    %c15_i32_24 = arith.constant 15 : i32
    %58 = tpu.dynamic_rotate %52 by %c15_i32_24 dim 0 : vector<16x32xf32>, i32 -> vector<16x32xf32>
    %cst_25 = arith.constant 0.000000e+00 : f32
    %59 = vector.shape_cast %22 : vector<16x1xi1> to vector<16x1xi1>
    %60 = vector.broadcast %59 : vector<16x1xi1> to vector<16x32xi1>
    %61 = vector.broadcast %cst_25 : f32 to vector<16x32xf32>
    %62 = arith.select %60, %58, %61 : vector<16x32xi1>, vector<16x32xf32>
    %63 = arith.truncf %57 : vector<16x32xf32> to vector<16x32xbf16>
    %c3 = arith.constant 3 : index
    %c0_26 = arith.constant 0 : index
    %c0_27 = arith.constant 0 : index
    %64 = vector.load %arg2[%c3, %c0_26, %c0_27] : memref<9x32x32xbf16, #tpu.memory_space<vmem>>, vector<1x32x32xbf16>
    %65 = vector.shape_cast %64 : vector<1x32x32xbf16> to vector<32x32xbf16>
    %cst_28 = arith.constant dense<0.000000e+00> : vector<16x32xf32>
    %66 = tpu.matmul %63, %65, %cst_28 {dimension_numbers = #tpu.dot_dimension_numbers<[1], [0], [0], [1], [0, 0, 1, 1], [], []>} : vector<16x32xbf16>, vector<32x32xbf16>, vector<16x32xf32> -> vector<16x32xf32>
    %67 = arith.truncf %52 : vector<16x32xf32> to vector<16x32xbf16>
    %c4 = arith.constant 4 : index
    %c0_29 = arith.constant 0 : index
    %c0_30 = arith.constant 0 : index
    %68 = vector.load %arg2[%c4, %c0_29, %c0_30] : memref<9x32x32xbf16, #tpu.memory_space<vmem>>, vector<1x32x32xbf16>
    %69 = vector.shape_cast %68 : vector<1x32x32xbf16> to vector<32x32xbf16>
    %cst_31 = arith.constant dense<0.000000e+00> : vector<16x32xf32>
    %70 = tpu.matmul %67, %69, %cst_31 {dimension_numbers = #tpu.dot_dimension_numbers<[1], [0], [0], [1], [0, 0, 1, 1], [], []>} : vector<16x32xbf16>, vector<32x32xbf16>, vector<16x32xf32> -> vector<16x32xf32>
    %71 = arith.addf %66, %70 : vector<16x32xf32>
    %72 = arith.truncf %62 : vector<16x32xf32> to vector<16x32xbf16>
    %c5 = arith.constant 5 : index
    %c0_32 = arith.constant 0 : index
    %c0_33 = arith.constant 0 : index
    %73 = vector.load %arg2[%c5, %c0_32, %c0_33] : memref<9x32x32xbf16, #tpu.memory_space<vmem>>, vector<1x32x32xbf16>
    %74 = vector.shape_cast %73 : vector<1x32x32xbf16> to vector<32x32xbf16>
    %cst_34 = arith.constant dense<0.000000e+00> : vector<16x32xf32>
    %75 = tpu.matmul %72, %74, %cst_34 {dimension_numbers = #tpu.dot_dimension_numbers<[1], [0], [0], [1], [0, 0, 1, 1], [], []>} : vector<16x32xbf16>, vector<32x32xbf16>, vector<16x32xf32> -> vector<16x32xf32>
    %76 = arith.addf %71, %75 : vector<16x32xf32>
    %c1_35 = arith.constant 1 : index
    %c0_36 = arith.constant 0 : index
    %c0_37 = arith.constant 0 : index
    %77 = vector.load %arg3[%c1_35, %c0_36, %c0_37] : memref<3x1x32xf32, #tpu.memory_space<vmem>>, vector<1x1x32xf32>
    %78 = vector.shape_cast %77 : vector<1x1x32xf32> to vector<1x32xf32>
    %79 = vector.broadcast %78 : vector<1x32xf32> to vector<16x32xf32>
    %80 = arith.addf %76, %79 : vector<16x32xf32>
    %cst_38 = arith.constant 0.000000e+00 : f32
    %81 = vector.broadcast %cst_38 : f32 to vector<16x32xf32>
    %82 = arith.maximumf %80, %81 : vector<16x32xf32>
    %c1_i32_39 = arith.constant 1 : i32
    %83 = tpu.dynamic_rotate %82 by %c1_i32_39 dim 0 : vector<16x32xf32>, i32 -> vector<16x32xf32>
    %cst_40 = arith.constant 0.000000e+00 : f32
    %84 = vector.shape_cast %20 : vector<16x1xi1> to vector<16x1xi1>
    %85 = vector.broadcast %84 : vector<16x1xi1> to vector<16x32xi1>
    %86 = vector.broadcast %cst_40 : f32 to vector<16x32xf32>
    %87 = arith.select %85, %83, %86 : vector<16x32xi1>, vector<16x32xf32>
    %c15_i32_41 = arith.constant 15 : i32
    %88 = tpu.dynamic_rotate %82 by %c15_i32_41 dim 0 : vector<16x32xf32>, i32 -> vector<16x32xf32>
    %cst_42 = arith.constant 0.000000e+00 : f32
    %89 = vector.shape_cast %22 : vector<16x1xi1> to vector<16x1xi1>
    %90 = vector.broadcast %89 : vector<16x1xi1> to vector<16x32xi1>
    %91 = vector.broadcast %cst_42 : f32 to vector<16x32xf32>
    %92 = arith.select %90, %88, %91 : vector<16x32xi1>, vector<16x32xf32>
    %93 = arith.truncf %87 : vector<16x32xf32> to vector<16x32xbf16>
    %c6 = arith.constant 6 : index
    %c0_43 = arith.constant 0 : index
    %c0_44 = arith.constant 0 : index
    %94 = vector.load %arg2[%c6, %c0_43, %c0_44] : memref<9x32x32xbf16, #tpu.memory_space<vmem>>, vector<1x32x32xbf16>
    %95 = vector.shape_cast %94 : vector<1x32x32xbf16> to vector<32x32xbf16>
    %cst_45 = arith.constant dense<0.000000e+00> : vector<16x32xf32>
    %96 = tpu.matmul %93, %95, %cst_45 {dimension_numbers = #tpu.dot_dimension_numbers<[1], [0], [0], [1], [0, 0, 1, 1], [], []>} : vector<16x32xbf16>, vector<32x32xbf16>, vector<16x32xf32> -> vector<16x32xf32>
    %97 = arith.truncf %82 : vector<16x32xf32> to vector<16x32xbf16>
    %c7 = arith.constant 7 : index
    %c0_46 = arith.constant 0 : index
    %c0_47 = arith.constant 0 : index
    %98 = vector.load %arg2[%c7, %c0_46, %c0_47] : memref<9x32x32xbf16, #tpu.memory_space<vmem>>, vector<1x32x32xbf16>
    %99 = vector.shape_cast %98 : vector<1x32x32xbf16> to vector<32x32xbf16>
    %cst_48 = arith.constant dense<0.000000e+00> : vector<16x32xf32>
    %100 = tpu.matmul %97, %99, %cst_48 {dimension_numbers = #tpu.dot_dimension_numbers<[1], [0], [0], [1], [0, 0, 1, 1], [], []>} : vector<16x32xbf16>, vector<32x32xbf16>, vector<16x32xf32> -> vector<16x32xf32>
    %101 = arith.addf %96, %100 : vector<16x32xf32>
    %102 = arith.truncf %92 : vector<16x32xf32> to vector<16x32xbf16>
    %c8 = arith.constant 8 : index
    %c0_49 = arith.constant 0 : index
    %c0_50 = arith.constant 0 : index
    %103 = vector.load %arg2[%c8, %c0_49, %c0_50] : memref<9x32x32xbf16, #tpu.memory_space<vmem>>, vector<1x32x32xbf16>
    %104 = vector.shape_cast %103 : vector<1x32x32xbf16> to vector<32x32xbf16>
    %cst_51 = arith.constant dense<0.000000e+00> : vector<16x32xf32>
    %105 = tpu.matmul %102, %104, %cst_51 {dimension_numbers = #tpu.dot_dimension_numbers<[1], [0], [0], [1], [0, 0, 1, 1], [], []>} : vector<16x32xbf16>, vector<32x32xbf16>, vector<16x32xf32> -> vector<16x32xf32>
    %106 = arith.addf %101, %105 : vector<16x32xf32>
    %c2_52 = arith.constant 2 : index
    %c0_53 = arith.constant 0 : index
    %c0_54 = arith.constant 0 : index
    %107 = vector.load %arg3[%c2_52, %c0_53, %c0_54] : memref<3x1x32xf32, #tpu.memory_space<vmem>>, vector<1x1x32xf32>
    %108 = vector.shape_cast %107 : vector<1x1x32xf32> to vector<1x32xf32>
    %109 = vector.broadcast %108 : vector<1x32xf32> to vector<16x32xf32>
    %110 = arith.addf %106, %109 : vector<16x32xf32>
    %cst_55 = arith.constant 0.000000e+00 : f32
    %111 = vector.broadcast %cst_55 : f32 to vector<16x32xf32>
    %112 = arith.maximumf %110, %111 : vector<16x32xf32>
    %113 = arith.truncf %112 : vector<16x32xf32> to vector<16x32xbf16>
    %c0_56 = arith.constant 0 : index
    %c0_57 = arith.constant 0 : index
    %114 = vector.load %arg4[%c0_56, %c0_57] : memref<32x128xbf16, #tpu.memory_space<vmem>>, vector<32x128xbf16>
    %cst_58 = arith.constant dense<0.000000e+00> : vector<16x128xf32>
    %115 = tpu.matmul %113, %114, %cst_58 {dimension_numbers = #tpu.dot_dimension_numbers<[1], [0], [0], [1], [0, 0, 1, 1], [], []>} : vector<16x32xbf16>, vector<32x128xbf16>, vector<16x128xf32> -> vector<16x128xf32>
    %c0_59 = arith.constant 0 : index
    %c0_60 = arith.constant 0 : index
    %116 = vector.load %arg5[%c0_59, %c0_60] : memref<1x128xf32, #tpu.memory_space<vmem>>, vector<1x128xf32>
    %117 = vector.broadcast %116 : vector<1x128xf32> to vector<16x128xf32>
    %118 = arith.addf %115, %117 : vector<16x128xf32>
    %119 = arith.truncf %118 : vector<16x128xf32> to vector<16x128xbf16>
    %c0_61 = arith.constant 0 : index
    %c0_62 = arith.constant 0 : index
    %120 = vector.load %arg6[%c0_61, %c0_62] : memref<16x128xbf16, #tpu.memory_space<vmem>>, vector<16x128xbf16>
    tpu.vector_store %arg6[%c0_61, %c0_62], %119 {strides = array<i32>} : memref<16x128xbf16, #tpu.memory_space<vmem>>, vector<16x128xbf16>,
    return
  }
  func.func @transform_0(%arg0: i32) -> (i32, i32) {
    %c0_i32 = arith.constant 0 : i32
    %c0_i32_0 = arith.constant 0 : i32
    return %arg0, %c0_i32 : i32, i32
  }
  func.func @transform_1(%arg0: i32) -> (i32, i32, i32) {
    %c0_i32 = arith.constant 0 : i32
    %c0_i32_0 = arith.constant 0 : i32
    %c0_i32_1 = arith.constant 0 : i32
    %c0_i32_2 = arith.constant 0 : i32
    return %c0_i32, %c0_i32_0, %c0_i32_1 : i32, i32, i32
  }
  func.func @transform_2(%arg0: i32) -> (i32, i32, i32) {
    %c0_i32 = arith.constant 0 : i32
    %c0_i32_0 = arith.constant 0 : i32
    %c0_i32_1 = arith.constant 0 : i32
    %c0_i32_2 = arith.constant 0 : i32
    return %c0_i32, %c0_i32_0, %c0_i32_1 : i32, i32, i32
  }
  func.func @transform_3(%arg0: i32) -> (i32, i32) {
    %c0_i32 = arith.constant 0 : i32
    %c0_i32_0 = arith.constant 0 : i32
    %c0_i32_1 = arith.constant 0 : i32
    return %c0_i32, %c0_i32_0 : i32, i32
  }
  func.func @transform_4(%arg0: i32) -> (i32, i32) {
    %c0_i32 = arith.constant 0 : i32
    %c0_i32_0 = arith.constant 0 : i32
    %c0_i32_1 = arith.constant 0 : i32
    return %c0_i32, %c0_i32_0 : i32, i32
  }
  func.func @transform_5(%arg0: i32) -> (i32, i32) {
    %c0_i32 = arith.constant 0 : i32
    %c0_i32_0 = arith.constant 0 : i32
    return %arg0, %c0_i32 : i32, i32
  }
}

</mosaic_0001>

<bundles_post_ra>
// kernel: tpu_custom_call.1
= control target key start
LH: loop header
LB: loop body
LE: loop exit
PB: predicated region body
PF: predicated region fallthrough
CT: control target
= control target key end

     0   :  { %10 = vsyncpa [#allocation3], 0  ;;  %s1971_s0 = inlined_call_operand.hbm [shape: bf16[32,32], index: 0, kind: input, shape index: {}]   ;;  %s1972_s1 = inlined_call_operand.hbm [shape: bf16[9,32,32], index: 1, kind: input, shape index: {}]   ;;  %s1973_s2 = inlined_call_operand.vmem [shape: f32[3,1,32], index: 2, kind: input, shape index: {}]   ;;  %s1974_s3 = inlined_call_operand.hbm [shape: bf16[32,128], index: 3, kind: input, shape index: {}]   ;;  %s1975_s4 = inlined_call_operand.vmem [shape: f32[1,128], index: 4, kind: input, shape index: {}]   ;;  %s1976_s5 = inlined_call_operand.hbm [shape: bf16[32,128], index: 5, kind: output, shape index: {}]  }
   0x1   :  { %12 = vsyncpa [#allocation3 + $0x1], 0 }
   0x2   :  { %13 = vsyncpa [#allocation6], 0 }
   0x3   :  { %14 = vsyncpa [#allocation4], 0 }
   0x4   :  { %16 = vsyncpa [#allocation4 + $0x1], 0  ;;  %s1612_s18 = smov 0   ;;  %s1614_s19 = smov 0  }
   0x5   :  { %s1616_s20 = smov 0   ;;  %s1618_s21 = smov 0  }
   0x6 LB: > { %s1633_s22 = sadd.s32 4294967295, %s1570_s21   ;;  %s1143_s23 = sadd.s32 4294967294, %s1570_s21   ;;  %s1570_s21 = sphi %s1618_s21, %s2000_s21   ;;  %s1566_s20 = sphi %s1616_s20, %s1999_s20   ;;  %s1562_s19 = sphi %s1614_s19, %s1998_s19   ;;  %s1558_s18 = sphi %s1612_s18, %s1997_s18  }
   0x7   : > { %p42_p0 = scmp.ne.s32.totalorder %s1562_s19, %s1558_s18  ;;  %p1977_p1 = scmp.eq.s32.totalorder %s1633_s22, 0 }
   0x8   : > { %p156_p3 = scmp.eq.s32.totalorder %s1143_s23, 1  ;;  %p1144_p5 = scmp.ge.s32.totalorder %s1570_s21, 1 }
   0x9   : > { %p1642_p4 = por %p1977_p1, %p42_p0  ;;  %p163_p7 = scmp.lt.s32.totalorder %s1570_s21, 3 }
   0xa   : > { %p1647_p6 = por %p156_p3, %p42_p0  ;;  %s1572_s27 = smov [#allocation5]  }
   0xb   : > { %s1980_s24 = scalar_select %p1642_p4, 1, 0 }
   0xc   : > { %s1981_s25 = scalar_select %p1647_p6, 1, 0 }
   0xd   : > { %p1652_p8 = pnand %p1144_p5, %p163_p7  ;;  %s175_s28 = sshll.u32 %s1572_s27, 4  ;;  %s1656_s28 = int_to_ptr.vmem [resolvable:$true] %s175_s28 }
   0xe   : > { %s1573_s30 = smov [#allocation7]   ;;  %s1414_s9 = scalar_lea.hbm %s1972_s1, 2304 }
   0xf   : > { %p1331_p9 = pneg %p1652_p8  ;;  %s191_s6 = sshll.u32 %s1573_s30, 4  ;;  %s1667_s6 = int_to_ptr.vmem [resolvable:$true] %s191_s6 }
  0x10   : > { %p1415_p12 = scmp.ne.s32.totalorder %s1972_s1, %s1414_s9  ;;  %p1421_p5 = scmp.lt.u32.totalorder %s1414_s9, %s1972_s1 }
  0x11   : > { %p1663_p11 = pnand %p1331_p9, %p1977_p1 }
  0x13   : > { %p1416_p13 = pneg %p1663_p11 }
  0x15   : > { %p1417_p0 = pnand %p1416_p13, %p1415_p12 }
  0x17   : > { %p1418_p3 = pneg %p1417_p0 }
  0x19   : > { %p1423_p7 = pnand %p1421_p5, %p1418_p3 }
  0x1b   : > { %1426 = shalt.err (!%p1423_p7)
}
  0x1c   : > { %s1427_s14 = scalar_lea.vmem %s1656_s28, 2304  ;;  %p1435_p2 = scmp.lt.s32.totalorder %s1656_s28, %s1656_s28 }
  0x1d   : > { %p1428_p9 = scmp.ne.s32.totalorder %s1656_s28, %s1427_s14  ;;  %p1436_p12 = scmp.lt.s32.totalorder %s1427_s14, %s1427_s14 }
  0x1f   : > { %p1430_p10 = pnand %p1428_p9, %p1416_p13  ;;  %p1437_p0 = por %p1436_p12, %p1435_p2 }
  0x21   : > { %p1431_p1 = pneg %p1430_p10 }
  0x23   : > { %p1438_p6 = pnand %p1437_p0, %p1431_p1 }
  0x25   : > { %1441 = shalt.err (!%p1438_p6)
}
  0x26   : > { %s1574_s15 = smov 64   ;;  %s1575_s16 = smov 4  }
  0x27   : > { %1334 = dma.hbm_to_vmem [thread:$0]  (!%p1663_p11), %s1972_s1, 2304, %s1656_s28, [#allocation6], %s1574_s15, %s1574_s15, %s1575_s16  }
  0x28   : > { %s1442_s7 = scalar_lea.hbm %s1974_s3, 256 }
  0x29   : > { %p1443_p1 = scmp.ne.s32.totalorder %s1974_s3, %s1442_s7  ;;  %p1449_p10 = scmp.lt.u32.totalorder %s1442_s7, %s1974_s3 }
  0x2b   : > { %p1445_p2 = pnand %p1443_p1, %p1416_p13 }
  0x2d   : > { %p1446_p6 = pneg %p1445_p2 }
  0x2f   : > { %p1451_p3 = pnand %p1449_p10, %p1446_p6 }
  0x31   : > { %1454 = shalt.err (!%p1451_p3)
}
  0x32   : > { %s1455_s28 = scalar_lea.vmem %s1667_s6, 256  ;;  %p1463_p12 = scmp.lt.s32.totalorder %s1667_s6, %s1667_s6 }
  0x33   : > { %p1456_p5 = scmp.ne.s32.totalorder %s1667_s6, %s1455_s28  ;;  %p1464_p0 = scmp.lt.s32.totalorder %s1455_s28, %s1455_s28 }
  0x35   : > { %p1458_p7 = pnand %p1456_p5, %p1416_p13  ;;  %p1465_p1 = por %p1464_p0, %p1463_p12 }
  0x37   : > { %p1459_p9 = pneg %p1458_p7 }
  0x39   : > { %p1466_p2 = pnand %p1465_p1, %p1459_p9 }
  0x3b   : > { %1469 = shalt.err (!%p1466_p2)
}
  0x3c   : > { %1337 = dma.hbm_to_vmem [thread:$0]  (!%p1663_p11), %s1974_s3, 256, %s1667_s6, [#allocation6], %s1574_s15, %s1574_s15, %s1575_s16  }
  0x3d   : > { %s1728_s29 = sadd.s32 1, %s1570_s21   ;;  %s29_s14 = sadd.s32 1, %s1566_s20 }
  0x3e   : > { %s26_s17 = ssub.s32 %s1570_s21, %s1728_s29  ;;  %p36_p13 = scmp.ne.s32.totalorder %s1566_s20, %s1562_s19 }
  0x3f   : > { %p27_p6 = scmp.eq.s32.totalorder %s26_s17, 0  ;;  %p37_p10 = scmp.eq.s32.totalorder %s1570_s21, 0 }
  0x40   : > { %p1984_p3 = scmp.eq.s32.totalorder %s1633_s22, 1  ;;  %p1348_p7 = scmp.lt.s32.totalorder %s1570_s21, 2 }
  0x41   : > { %s1744_s27 = scalar_select %p27_p6, %s1566_s20, %s29_s14  }
  0x42   : > { %p1738_p5 = por %p1984_p3, %p36_p13  ;;  %p38_p9 = por %p37_p10, %p36_p13 }
  0x43   : > { %s208_s30 = sand.u32 1, %s1566_s20   ;;  %s1200_s6 = sshll.u32 %s1570_s21, 7 }
  0x44   : > { %s1985_s23 = scalar_select %p1738_p5, 1, 0 }
  0x45   : > { %s1148_s7 = sshll.u32 %s208_s30, 3  ;;  %s1751_s10 = scalar_lea.hbm %s1971_s0, %s1200_s6 }
  0x46   : > { %s212_s11 = scalar_lea.vmem [#allocation2], %s1148_s7  ;;  %p1755_p11 = pnand %p1348_p7, %p38_p9 }
  0x47   : > { %s219_s28 = sshll.u32 %s212_s11, 4  ;;  %s1759_s13 = scalar_lea.sflag [#allocation3], %s208_s30  ;;  %s1753_s28 = int_to_ptr.vmem [resolvable:$true] %s219_s28 }
  0x48   : > { %s1470_s14 = scalar_lea.hbm %s1751_s10, 128  ;;  %p1472_p0 = pneg %p1755_p11 }
  0x49   : > { %p1471_p12 = scmp.ne.s32.totalorder %s1751_s10, %s1470_s14  ;;  %s1475_s6 = scalar_lea.hbm %s1971_s0, 256 }
  0x4a   : > { %p1476_p13 = scmp.lt.u32.totalorder %s1751_s10, %s1971_s0  ;;  %p1477_p6 = scmp.lt.u32.totalorder %s1475_s6, %s1470_s14 }
  0x4b   : > { %p1473_p1 = pnand %p1472_p0, %p1471_p12  ;;  %p1479_p3 = scmp.lt.u32.totalorder %s1470_s14, %s1751_s10 }
  0x4c   : > { %p1478_p10 = por %p1477_p6, %p1476_p13 }
  0x4d   : > { %p1474_p2 = pneg %p1473_p1 }
  0x4e   : > { %p1480_p7 = por %p1479_p3, %p1478_p10 }
  0x50   : > { %p1481_p9 = pnand %p1480_p7, %p1474_p2 }
  0x52   : > { %1484 = shalt.err (!%p1481_p9)
}
  0x53   : > { %s1485_s30 = scalar_lea.vmem %s1753_s28, 128  ;;  %s1576_s11 = smov [#allocation2]  }
  0x54   : > { %p1486_p12 = scmp.ne.s32.totalorder %s1753_s28, %s1485_s30  ;;  %s1490_s17 = sshll.u32 %s1576_s11, 4  ;;  %s1491_s17 = int_to_ptr.vmem [resolvable:$false] %s1490_s17 }
  0x55   : > { %s1492_s7 = scalar_lea.vmem %s1491_s17, 256  ;;  %p1493_p4 = scmp.lt.s32.totalorder %s1753_s28, %s1491_s17 }
  0x56   : > { %p1488_p1 = pnand %p1486_p12, %p1472_p0  ;;  %p1494_p13 = scmp.lt.s32.totalorder %s1492_s7, %s1485_s30 }
  0x58   : > { %p1489_p5 = pneg %p1488_p1  ;;  %p1495_p6 = por %p1494_p13, %p1493_p4 }
  0x5a   : > { %p1496_p10 = pnand %p1495_p6, %p1489_p5 }
  0x5c   : > { %1499 = shalt.err (!%p1496_p10)
}
  0x5d   : > { %1341 = dma.hbm_to_vmem [thread:$0]  (!%p1755_p11), %s1751_s10, 128, %s1753_s28, %s1759_s13, %s1574_s15, %s1574_s15, %s1575_s16  }
  0x5e   : > { %231 = sbr.rel (%p1652_p8) target bundleno = 1038 (0x40e), region = 40  ;;  %s1793_s14 = sand.u32 (!%p1652_p8), 1, %s1562_s19  }
  0x5f   : > { %s1152_s6 = sshll.u32 (!%p1652_p8), %s1793_s14, 3  ;;  %s234_s8 = scalar_lea.sflag (!%p1652_p8), [#allocation3], %s1793_s14 }
  0x60   : > { %s237_s12 = scalar_lea.vmem (!%p1652_p8), [#allocation2], %s1152_s6  ;;  %p1987_p4 = scmp.ne.s32.totalorder (!%p1652_p8), %s1980_s24, 0 }
  0x65   : > { %1545 = dma.done.wait (%p1987_p4), %s234_s8, 128  }
  0x66   : > { %1547 = vsyncadd (%p1987_p4), %s234_s8, 4294967168  ;;  %p1988_p5 = scmp.eq.s32.totalorder %s1633_s22, 0 }
  0x68   : > { %1549 = dma.done.wait (%p1988_p5), [#allocation6], 2560   ;;  %p1989_p8 = pmov %p1988_p5 }
  0x69   : > { %v279_v0 = vlaneseq  ;;  %v1577_v1 = vmov 0.0   ;;  %vm1578_vm0 = vmmov 0   ;;  %v1392_v4 = vld [vmem:[#allocation5 + $0x10] sm:$0xff]   ;;  %vm359_vm1 = vcmask 261120   ;;  %v1393_v5 = vld [vmem:[#allocation5] sm:$0xff]   ;;  %v1394_v7 = vld [vmem:[#allocation5 + $0x18] sm:$0xff]  }
  0x6a   : > { %1551 = vsyncadd (%p1989_p8), [#allocation6], 4294964736  ;;  %1239 = vmatprep.subr.bf16.mxu0 %v1577_v1  ;;  %1247 = vmatprep.subr.bf16.mxu1 %v1577_v1  ;;  %v1395_v9 = vld [vmem:[#allocation5 + $0x8] sm:$0xff]   ;;  %v275_v10 = vld [vmem:[%s237_s12] sm:$0xff]   ;;  %s271_s30 = scalar_lea.vmem [#allocation8], %s1152_s6  ;;  %s1203_s17 = sshll.u32 %s1633_s22, 7 }
  0x6b   : > { %1243 = vmatprep.mubr.msk.bf16.mxu0 %vm1578_vm0, %v1577_v1  ;;  %1251 = vmatprep.mubr.msk.bf16.mxu1 %vm1578_vm0, %v1577_v1  ;;  %v1813_v2 = vshrl.u32 %v279_v0, 7  ;;  %v277_v11 = vunpack.c.l.bf16 %v275_v10  ;;  %v278_v12 = vunpack.c.h.bf16 %v275_v10  ;;  %v1397_v14 = vld [vmem:[#allocation5 + $0x20] sm:$0xff]   ;;  %v1398_v20 = vld [vmem:[#allocation5 + $0x28] sm:$0xff]   ;;  %v1401_v31 = vld [vmem:[#allocation5 + $0x30] sm:$0xff]   ;;  %s1051_s11 = sshll.u32 %s271_s30, 4  ;;  %s1927_s12 = scalar_lea.hbm %s1976_s5, %s1203_s17  ;;  %s1922_s11 = int_to_ptr.vmem [resolvable:$true] %s1051_s11 }
  0x6c   : > { %1240 = vmatpush3.bf16.msra.mxu0 %v1392_v4  ;;  %1248 = vmatpush3.bf16.msra.mxu1 %v1393_v5  ;;  %v1399_v29 = vld [vmem:[#allocation5 + $0x40] sm:$0xff]   ;;  %v1400_v30 = vld [vmem:[#allocation5 + $0x48] sm:$0xff]   ;;  %v1402_v32 = vld [vmem:[#allocation5 + $0x38] sm:$0xff]   ;;  %s1038_s24 = scalar_lea.sflag [#allocation4], %s1793_s14  ;;  %s1500_s6 = scalar_lea.vmem %s1922_s11, 128 }
  0x6d   : > { %v281_v3 = vadd.s32 8, %v1813_v2  ;;  %v286_v6 = vand.u32 15, %v1813_v2  ;;  %1241 = vmatprep.subr.bf16.mxu0 %v1577_v1  ;;  %vm312_vm2 = vcmp.lt.s32.totalorder %v1813_v2, 1  ;;  %1249 = vmatprep.subr.bf16.mxu1 %v1577_v1  ;;  %vm323_vm3 = vcmp.lt.s32.totalorder %v1813_v2, 7  ;;  %v1166_v44 = vld [vmem:[%s1973_s2] ss:$0 sm:$0xff]  ;;  %p1501_p11 = scmp.ne.s32.totalorder %s1922_s11, %s1500_s6 }
  0x6e   : > { %v310_v16 = vrot.slane %v277_v11, 7  ;;  %v311_v17 = vrot.slane %v278_v12, 7  ;;  %v321_v18 = vrot.slane %v277_v11, 1  ;;  %v322_v19 = vrot.slane %v278_v12, 1  ;;  %v1403_v55 = vld [vmem:[#allocation5 + $0x50] sm:$0xff]   ;;  %v1412_v13 = vld [vmem:[#allocation7 + $0x8] sm:$0xff]  }
  0x6f   : > { %v293_v8 = vand.u32 15, %v281_v3  ;;  %vm1821_vm4 = vcmp.ne.s32.totalorder %v286_v6, 0  ;;  %v1404_v3 = vld [vmem:[#allocation5 + $0x58] sm:$0xff]   ;;  %v1411_v2 = vld [vmem:[#allocation7] sm:$0xff]   ;;  %p1994_p0 = scmp.ne.s32.totalorder %s1985_s23, 0  ;;  %s1579_s22 = smov [#allocation8]  }
  0x70   : > { %1242 = vmatpush3.bf16.msra.mxu0 %v1394_v7  ;;  %1250 = vmatpush3.bf16.msra.mxu1 %v1395_v9  ;;  %v313_v21 = vsel %vm312_vm2, %v310_v16, %v311_v17  ;;  %v314_v22 = vsel %vm312_vm2, %v311_v17, %v310_v16  ;;  %v325_v23 = vsel %vm323_vm3, %v322_v19, %v321_v18  ;;  %v1405_v7 = vld [vmem:[#allocation5 + $0x70] sm:$0xff]   ;;  %v1407_v9 = vld [vmem:[#allocation5 + $0x60] sm:$0xff]   ;;  %s1504_s26 = sshll.u32 %s1579_s22, 4  ;;  %s1505_s26 = int_to_ptr.vmem [resolvable:$false] %s1504_s26 }
  0x71   : > { %vm1825_vm5 = vcmp.ne.s32.totalorder %v293_v8, 15  ;;  %1255 = vmatprep.subr.bf16.mxu0 %v1577_v1  ;;  %1263 = vmatprep.subr.bf16.mxu1 %v1577_v1  ;;  %v319_v24 = vsel %vm1821_vm4, %v314_v22, 0.0  ;;  %v324_v25 = vsel %vm323_vm3, %v321_v18, %v322_v19  ;;  %v1406_v8 = vld [vmem:[#allocation5 + $0x78] sm:$0xff]   ;;  %p1502_p2 = pnand %p1501_p11, %p1994_p0  ;;  %s1506_s15 = scalar_lea.vmem %s1505_s26, 256 }
  0x72   : > { %v331_v26 = vsel %vm1825_vm5, %v325_v23, 0.0  ;;  %v332_v27 = vpack.c.bf16 %v313_v21, %v319_v24  ;;  %v1177_v24 = vld [vmem:[%s1973_s2 + $0x1] ss:$0 sm:$0xff]  ;;  %p1507_p7 = scmp.lt.s32.totalorder %s1922_s11, %s1505_s26  ;;  %p1508_p9 = scmp.lt.s32.totalorder %s1506_s15, %s1500_s6 }
  0x73   : > { %1244 = vmatmul.mubr.msk.bf16.vlgmr.msra.gmra.mrb[0].mxu0 %vm359_vm1, %v275_v10  ;;  %v460_v28 = vpack.c.bf16 %v331_v26, %v324_v25  ;;  %v1408_v10 = vld [vmem:[#allocation5 + $0x68] sm:$0xff]   ;;  %p1503_p3 = pneg %p1502_p2 }
  0x74   : > { %1256 = vmatpush3.bf16.msra.mxu0 %v1397_v14  ;;  %1259 = vmatprep.mubr.msk.bf16.mxu0 %vm1578_vm0, %v1577_v1  ;;  %p1509_p12 = por %p1508_p9, %p1507_p7 }
  0x75   : > { %1257 = vmatprep.subr.bf16.mxu0 %v1577_v1  ;;  %1252 = vmatmul.mubr.msk.bf16.vlgmr.msra.gmra.mrb[0].mxu1 %vm359_vm1, %v332_v27 }
  0x76   : > { %1267 = vmatprep.mubr.msk.bf16.mxu1 %vm1578_vm0, %v1577_v1  ;;  %1264 = vmatpush3.bf16.msra.mxu1 %v1399_v29  ;;  %p1510_p1 = pnand %p1509_p12, %p1503_p3 }
  0x77   : > { %1265 = vmatprep.subr.bf16.mxu1 %v1577_v1 }
  0x78   : > { %1258 = vmatpush3.bf16.msra.mxu0 %v1398_v20 }
  0x79   : > { %1271 = vmatprep.subr.bf16.mxu0 %v1577_v1 }
  0x7a   : > { %1266 = vmatpush3.bf16.msra.mxu1 %v1400_v30 }
  0x7b   : > { %1260 = vmatmul.mubr.msk.bf16.vlgmr.msra.gmra.mrb[4].mxu0 %vm359_vm1, %v460_v28  ;;  %1279 = vmatprep.subr.bf16.mxu1 %v1577_v1 }
  0x7c   : > { %1275 = vmatprep.mubr.msk.bf16.mxu0 %vm1578_vm0, %v1577_v1  ;;  %1272 = vmatpush3.bf16.msra.mxu0 %v1401_v31 }
  0x7d   : > { %1273 = vmatprep.subr.bf16.mxu0 %v1577_v1 }
  0x80   : > { %1274 = vmatpush3.bf16.msra.mxu0 %v1402_v32 }
  0x81   : > { %1287 = vmatprep.subr.bf16.mxu0 %v1577_v1 }
 0x146   : > { %v397_v33 = vpop.f32.mrb[0].mxu0 }
 0x147   : > { %v1245_v34 = vpop.f32.mrb[1].mxu0 }
 0x148   : > { %v400_v35 = vpop.f32.mrb[2].mxu0  ;;  %v453_v37 = vpop.f32.mrb[0].mxu1 }
 0x149   : > { %v1246_v36 = vpop.f32.mrb[3].mxu0  ;;  %v454_v38 = vadd.f32 %v453_v37, %v397_v33  ;;  %v1253_v39 = vpop.f32.mrb[1].mxu1 }
 0x14a   : > { %v456_v40 = vpop.f32.mrb[2].mxu1 }
 0x14b   : > { %v457_v41 = vadd.f32 %v456_v40, %v400_v35  ;;  %v1254_v42 = vpop.f32.mrb[3].mxu1  ;;  %v1409_v35 = vld [vmem:[#allocation5 + $0x80] sm:$0xff]  }
 0x14e   : > { %v515_v43 = vpop.f32.mrb[4].mxu0 }
 0x14f   : > { %v522_v45 = vadd.f32 %v515_v43, %v454_v38  ;;  %v1261_v46 = vpop.f32.mrb[5].mxu0 }
 0x150   : > { %v518_v47 = vpop.f32.mrb[6].mxu0 }
 0x151   : > { %v531_v48 = vadd.f32 %v1166_v44, %v522_v45  ;;  %v523_v49 = vadd.f32 %v518_v47, %v457_v41  ;;  %v1262_v50 = vpop.f32.mrb[7].mxu0  ;;  %v1410_v45 = vld [vmem:[#allocation5 + $0x88] sm:$0xff]  }
 0x153   : > { %v533_v51 = vmax.f32 %v531_v48, 0.0  ;;  %v532_v52 = vadd.f32 %v1166_v44, %v523_v49 }
 0x155   : > { %v534_v53 = vmax.f32 %v532_v52, 0.0  ;;  %v535_v54 = vrot.slane %v533_v51, 7  ;;  %v541_v56 = vrot.slane %v533_v51, 1 }
 0x157   : > { %v536_v57 = vrot.slane %v534_v53, 7  ;;  %v542_v58 = vrot.slane %v534_v53, 1  ;;  %v553_v59 = vpack.c.bf16 %v534_v53, %v533_v51 }
 0x159   : > { %v537_v60 = vsel %vm312_vm2, %v535_v54, %v536_v57  ;;  %v538_v61 = vsel %vm312_vm2, %v536_v57, %v535_v54  ;;  %v543_v62 = vsel %vm323_vm3, %v541_v56, %v542_v58  ;;  %v544_v63 = vsel %vm323_vm3, %v542_v58, %v541_v56  ;;  %1268 = vmatmul.mubr.msk.bf16.vlgmr.msra.gmra.mrb[4].mxu1 %vm359_vm1, %v553_v59  ;;  %v1188_v59 = vld [vmem:[%s1973_s2 + $0x2] ss:$0 sm:$0xff] }
 0x15a   : > { %1280 = vmatpush3.bf16.msra.mxu1 %v1403_v55  ;;  %v539_v0 = vsel %vm1821_vm4, %v538_v61, 0.0  ;;  %1283 = vmatprep.mubr.msk.bf16.mxu1 %vm1578_vm0, %v1577_v1  ;;  %v546_v4 = vsel %vm1825_vm5, %v544_v63, 0.0 }
 0x15b   : > { %v547_v5 = vpack.c.bf16 %v537_v60, %v539_v0  ;;  %1281 = vmatprep.subr.bf16.mxu1 %v1577_v1  ;;  %v671_v6 = vpack.c.bf16 %v546_v4, %v543_v62 }
 0x15d   : > { %1276 = vmatmul.mubr.msk.bf16.vlgmr.msra.gmra.mrb[8].mxu0 %vm359_vm1, %v547_v5 }
 0x15e   : > { %1282 = vmatpush3.bf16.msra.mxu1 %v1404_v3  ;;  %1291 = vmatprep.mubr.msk.bf16.mxu0 %vm1578_vm0, %v1577_v1 }
 0x15f   : > { %1295 = vmatprep.subr.bf16.mxu1 %v1577_v1  ;;  %1288 = vmatpush3.bf16.msra.mxu0 %v1405_v7  ;;  %v1189_v7 = vld [vmem:[%s1975_s4] ss:$0 sm:$0xff] }
 0x160   : > { %1289 = vmatprep.subr.bf16.mxu0 %v1577_v1 }
 0x161   : > { %1284 = vmatmul.mubr.msk.bf16.vlgmr.msra.gmra.mrb[8].mxu1 %vm359_vm1, %v671_v6 }
 0x162   : > { %1299 = vmatprep.mubr.msk.bf16.mxu1 %vm1578_vm0, %v1577_v1  ;;  %1296 = vmatpush3.bf16.msra.mxu1 %v1407_v9 }
 0x163   : > { %1290 = vmatpush3.bf16.msra.mxu0 %v1406_v8  ;;  %1297 = vmatprep.subr.bf16.mxu1 %v1577_v1 }
 0x164   : > { %1303 = vmatprep.subr.bf16.mxu0 %v1577_v1 }
 0x166   : > { %1298 = vmatpush3.bf16.msra.mxu1 %v1408_v10 }
 0x167   : > { %1311 = vmatprep.subr.bf16.mxu1 %v1577_v1 }
 0x22c   : > { %v608_v11 = vpop.f32.mrb[4].mxu1 }
 0x22d   : > { %v1269_v12 = vpop.f32.mrb[5].mxu1 }
 0x22e   : > { %v611_v14 = vpop.f32.mrb[6].mxu1 }
 0x22f   : > { %v1270_v16 = vpop.f32.mrb[7].mxu1 }
 0x230   : > { %v664_v17 = vpop.f32.mrb[8].mxu0 }
 0x231   : > { %v665_v18 = vadd.f32 %v664_v17, %v608_v11  ;;  %v1277_v19 = vpop.f32.mrb[9].mxu0 }
 0x232   : > { %v667_v20 = vpop.f32.mrb[10].mxu0 }
 0x233   : > { %v668_v21 = vadd.f32 %v667_v20, %v611_v14  ;;  %v1278_v22 = vpop.f32.mrb[11].mxu0 }
 0x234   : > { %v726_v23 = vpop.f32.mrb[8].mxu1 }
 0x235   : > { %v733_v25 = vadd.f32 %v726_v23, %v665_v18  ;;  %v1285_v26 = vpop.f32.mrb[9].mxu1 }
 0x236   : > { %v729_v27 = vpop.f32.mrb[10].mxu1 }
 0x237   : > { %v743_v28 = vadd.f32 %v1177_v24, %v733_v25  ;;  %v734_v29 = vadd.f32 %v729_v27, %v668_v21  ;;  %v1286_v30 = vpop.f32.mrb[11].mxu1 }
 0x239   : > { %v745_v31 = vmax.f32 %v743_v28, 0.0  ;;  %v744_v32 = vadd.f32 %v1177_v24, %v734_v29 }
 0x23b   : > { %v746_v33 = vmax.f32 %v744_v32, 0.0  ;;  %v747_v34 = vrot.slane %v745_v31, 7  ;;  %v753_v36 = vrot.slane %v745_v31, 1 }
 0x23d   : > { %v748_v37 = vrot.slane %v746_v33, 7  ;;  %v754_v38 = vrot.slane %v746_v33, 1  ;;  %v765_v39 = vpack.c.bf16 %v746_v33, %v745_v31 }
 0x23f   : > { %v749_v40 = vsel %vm312_vm2, %v747_v34, %v748_v37  ;;  %v750_v41 = vsel %vm312_vm2, %v748_v37, %v747_v34  ;;  %v755_v42 = vsel %vm323_vm3, %v753_v36, %v754_v38  ;;  %v756_v43 = vsel %vm323_vm3, %v754_v38, %v753_v36  ;;  %1292 = vmatmul.mubr.msk.bf16.vlgmr.msra.gmra.mrb[12].mxu0 %vm359_vm1, %v765_v39 }
 0x240   : > { %1304 = vmatpush3.bf16.msra.mxu0 %v1409_v35  ;;  %v751_v44 = vsel %vm1821_vm4, %v750_v41, 0.0  ;;  %1307 = vmatprep.mubr.msk.bf16.mxu0 %vm1578_vm0, %v1577_v1  ;;  %v758_v46 = vsel %vm1825_vm5, %v756_v43, 0.0 }
 0x241   : > { %v759_v47 = vpack.c.bf16 %v749_v40, %v751_v44  ;;  %1305 = vmatprep.subr.bf16.mxu0 %v1577_v1  ;;  %v883_v48 = vpack.c.bf16 %v758_v46, %v755_v42 }
 0x243   : > { %1300 = vmatmul.mubr.msk.bf16.vlgmr.msra.gmra.mrb[12].mxu1 %vm359_vm1, %v759_v47 }
 0x244   : > { %1306 = vmatpush3.bf16.msra.mxu0 %v1410_v45  ;;  %1315 = vmatprep.mubr.msk.bf16.mxu1 %vm1578_vm0, %v1577_v1 }
 0x245   : > { %1312 = vmatpush3.bf16.msra.mxu1 %v1411_v2 }
 0x246   : > { %1313 = vmatprep.subr.bf16.mxu1 %v1577_v1 }
 0x247   : > { %1308 = vmatmul.mubr.msk.bf16.vlgmr.msra.gmra.mrb[16].mxu0 %vm359_vm1, %v883_v48 }
 0x249   : > { %1314 = vmatpush3.bf16.msra.mxu1 %v1412_v13 }
 0x312   : > { %v820_v15 = vpop.f32.mrb[12].mxu0 }
 0x313   : > { %v1293_v49 = vpop.f32.mrb[13].mxu0 }
 0x314   : > { %v823_v50 = vpop.f32.mrb[14].mxu0 }
 0x315   : > { %v1294_v51 = vpop.f32.mrb[15].mxu0 }
 0x316   : > { %v876_v52 = vpop.f32.mrb[12].mxu1 }
 0x317   : > { %v877_v53 = vadd.f32 %v876_v52, %v820_v15  ;;  %v1301_v54 = vpop.f32.mrb[13].mxu1 }
 0x318   : > { %v879_v55 = vpop.f32.mrb[14].mxu1 }
 0x319   : > { %v880_v56 = vadd.f32 %v879_v55, %v823_v50  ;;  %v1302_v57 = vpop.f32.mrb[15].mxu1 }
 0x31a   : > { %v938_v58 = vpop.f32.mrb[16].mxu0 }
 0x31b   : > { %v945_v60 = vadd.f32 %v938_v58, %v877_v53  ;;  %v1309_v1 = vpop.f32.mrb[17].mxu0 }
 0x31c   : > { %v941_v61 = vpop.f32.mrb[18].mxu0 }
 0x31d   : > { %v955_v62 = vadd.f32 %v1188_v59, %v945_v60  ;;  %v946_v63 = vadd.f32 %v941_v61, %v880_v56  ;;  %v1310_v0 = vpop.f32.mrb[19].mxu0 }
 0x31f   : > { %v956_v3 = vadd.f32 %v1188_v59, %v946_v63  ;;  %v957_v4 = vmax.f32 %v955_v62, 0.0 }
 0x321   : > { %v958_v5 = vmax.f32 %v956_v3, 0.0 }
 0x323   : > { %v959_v6 = vpack.c.bf16 %v958_v5, %v957_v4 }
 0x325   : > { %1316 = vmatmul.mubr.msk.bf16.vlgmr.msra.gmra.mrb[16].mxu1 %vm359_vm1, %v959_v6 }
 0x3f8   : > { %v1020_v8 = vpop.f32.mrb[16].mxu1 }
 0x3f9   : > { %v1317_v9 = vpop.f32.mrb[17].mxu1  ;;  %v1021_v11 = vadd.f32 %v1189_v7, %v1020_v8 }
 0x3fa   : > { %v1023_v10 = vpop.f32.mrb[18].mxu1 }
 0x3fb   : > { %v1024_v12 = vadd.f32 %v1189_v7, %v1023_v10  ;;  %v1318_v14 = vpop.f32.mrb[19].mxu1 }
 0x3fd   : > { %v1207_v16 = vpack.c.bf16 %v1024_v12, %v1021_v11 }
 0x3ff   : > { %1208 = vst [vmem:[%s271_s30] sm:$0xff] %v1207_v16  }
 0x400   : > { %1513 = shalt.err (!%p1510_p1)
}
 0x401   : > { %s1514_s16 = scalar_lea.hbm %s1927_s12, 128  ;;  %s1518_s13 = scalar_lea.hbm %s1976_s5, 256 }
 0x402   : > { %p1515_p13 = scmp.ne.s32.totalorder %s1927_s12, %s1514_s16  ;;  %p1519_p4 = scmp.lt.u32.totalorder %s1927_s12, %s1976_s5 }
 0x403   : > { %p1520_p5 = scmp.lt.u32.totalorder %s1518_s13, %s1514_s16  ;;  %p1522_p11 = scmp.lt.u32.totalorder %s1514_s16, %s1927_s12 }
 0x404   : > { %p1516_p6 = pnand %p1515_p13, %p1994_p0 }
 0x405   : > { %p1521_p8 = por %p1520_p5, %p1519_p4 }
 0x406   : > { %p1517_p10 = pneg %p1516_p6 }
 0x407   : > { %p1523_p2 = por %p1522_p11, %p1521_p8 }
 0x409   : > { %p1524_p3 = pnand %p1523_p2, %p1517_p10 }
 0x40b   : > { %1527 = shalt.err (!%p1524_p3)
}
 0x40c   : > { %s1580_s17 = smov 64   ;;  %s1581_s7 = smov 4  }
 0x40d   : > { %1329 = dma.vmem_to_hbm [thread:$0]  (%p1994_p0), %s1922_s11, 128, %s1927_s12, %s1038_s24, %s1580_s17, %s1580_s17, %s1581_s7  }
 0x40e PF: > { %s1066_s8 = sand.u32 1, %s1558_s18   ;;  %p1995_p7 = scmp.ne.s32.totalorder %s1981_s25, 0 }
 0x40f   : > { %p1996_p9 = scmp.ge.s32.totalorder %s1570_s21, 2  ;;  %s1067_s6 = scalar_lea.sflag [#allocation4], %s1066_s8 }
 0x411   : > { %p1343_p12 = pnand %p1996_p9, %p1995_p7 }
 0x413   : > { %1553 = dma.done.wait (!%p1343_p12), %s1067_s6, 128  }
 0x414   : > { %1555 = vsyncadd (!%p1343_p12), %s1067_s6, 4294967168  ;;  %p19_p1 = scmp.ge.s32.totalorder %s1728_s29, 4   ;;  %s1997_s18 = smov %s1562_s19 }
 0x415   : > { %s1998_s19 = smov %s1566_s20  ;;  %s1999_s20 = smov %s1744_s27 }
 0x416   : > { %s2000_s21 = smov %s1728_s29  ;;  %21 = sbr.rel (!%p19_p1) target bundleno = 6 (0x6), region = 103 }
 0x41d   :  { %1072 = vsyncpa [#allocation3], 1 }
 0x41e   :  { %1074 = vsyncpa [#allocation3 + $0x1], 1 }
 0x41f   :  { %1075 = vsyncpa [#allocation6], 1 }
 0x420   :  { %1076 = vsyncpa [#allocation4], 1 }
 0x421   :  { %1078 = vsyncpa [#allocation4 + $0x1], 1 }

</bundles_post_ra>
